<compile_context>
chip_gen: v7x
topology: tpu7x:2x2x1
jax: 0.10.0
libtpu: 0.0.40
codegen_flags: <defaults>
</compile_context>

<pallas_src>
import functools

import jax
import jax.numpy as jnp
from jax import lax
from jax.experimental import pallas as pl
from jax.experimental.pallas import tpu as pltpu


def _get_gradient_kernel(cur_ref, prev_ref, next_ref, o_ref, *, H, W, TH):
    """cur_ref: (TH, W) row tile; prev/next_ref: (8, W) halo blocks; o_ref: (TH, W)."""
    f32 = jnp.float32
    cur = cur_ref[...].astype(f32)                  # current row tile
    prev_row = prev_ref[7:8, :].astype(f32)         # (1, W) global row t*TH - 1
    next_row = next_ref[0:1, :].astype(f32)         # (1, W) global row (t+1)*TH

    t = pl.program_id(1)
    lrow = lax.broadcasted_iota(jnp.int32, (TH, W), 0)   # local row in tile
    col = lax.broadcasted_iota(jnp.int32, (TH, W), 1)    # column index
    grow = lrow + t * TH                                 # global row index

    # Vertical neighbours: sublane roll (XLU) + halo rows + zero padding at image edge.
    x_dn = pltpu.roll(cur, shift=TH - 1, axis=0)         # == roll by -1: row i -> x[i+1]
    x_dn = jnp.where(lrow == TH - 1, next_row, x_dn)     # cross-tile row from next halo
    x_dn = jnp.where(grow == H - 1, 0.0, x_dn)           # zero pad below the image
    x_up = pltpu.roll(cur, shift=1, axis=0)              # row i -> x[i-1]
    x_up = jnp.where(lrow == 0, prev_row, x_up)          # cross-tile row from prev halo
    x_up = jnp.where(grow == 0, 0.0, x_up)               # zero pad above the image

    # Horizontal neighbours: lane roll (XLU) + zero padding at the image edge.
    x_rt = jnp.where(col == W - 1, 0.0, pltpu.roll(cur, shift=W - 1, axis=1))  # x[i,j+1]
    x_lt = jnp.where(col == 0, 0.0, pltpu.roll(cur, shift=1, axis=1))          # x[i,j-1]

    x_v = x_dn - x_up
    x_h = x_rt - x_lt
    o_ref[...] = jnp.sqrt(x_v * x_v + x_h * x_h + f32(1e-6)).astype(o_ref.dtype)


def _pick_tile_rows(H, W, in_itemsize, out_itemsize,
                    budget_bytes=12 * 1024 * 1024):
    """Pick a row-tile height (multiple of 8) so double-buffered in+out+halos stay
    well under the default scoped-VMEM limits on v5e (16 MiB) / v6e / v7x (32 MiB)."""
    per_row = 2 * W * (in_itemsize + out_itemsize)       # double-buffered in+out per row
    halo = 2 * 2 * 8 * W * in_itemsize                   # double-buffered 8-row halos
    th = (budget_bytes - halo) // max(per_row, 1)
    th = max(8, min(512, (th // 8) * 8))
    th = min(th, ((H + 7) // 8) * 8)                     # never more rows than the image
    return max(8, (th // 8) * 8)


def get_gradient(x, *, tile_rows=None):
    """x: (N, 1, H, W) float -> (N, 1, H, W) gradient magnitude (same dtype)."""
    N, C, H, W = x.shape
    assert C == 1, "GetGradient's conv weights are (1,1,3,3): input must have 1 channel"
    x3 = x.reshape(N, H, W)
    out_dtype = x3.dtype
    in_itemsize = jnp.dtype(x3.dtype).itemsize
    out_itemsize = jnp.dtype(out_dtype).itemsize

    TH = tile_rows if tile_rows is not None else _pick_tile_rows(
        H, W, in_itemsize, out_itemsize)
    assert TH % 8 == 0
    n_tiles = pl.cdiv(H, TH)
    nb8 = pl.cdiv(H, 8)          # number of 8-row blocks along H (for halo specs)
    th8 = TH // 8

    # Block index maps (N-dim squeezed; row dim in units of TH for cur/out, 8 for halos).
    def cur_map(n, t):
        return (n, t, 0)

    def prev_map(n, t):          # 8 rows just above the tile (clamped at the top)
        return (n, jnp.maximum(t * th8 - 1, 0), 0)

    def next_map(n, t):          # 8 rows just below the tile (clamped at the bottom)
        return (n, jnp.minimum((t + 1) * th8, nb8 - 1), 0)

    kernel = functools.partial(_get_gradient_kernel, H=H, W=W, TH=TH)

    cost = pl.CostEstimate(
        flops=6 * N * H * W,
        transcendentals=N * H * W,
        bytes_accessed=N * H * W * (in_itemsize + out_itemsize),
    )

    out = pl.pallas_call(
        kernel,
        out_shape=jax.ShapeDtypeStruct((N, H, W), out_dtype),
        grid_spec=pltpu.PrefetchScalarGridSpec(
            num_scalar_prefetch=0,
            grid=(N, n_tiles),
            in_specs=[
                pl.BlockSpec((None, TH, W), cur_map),
                pl.BlockSpec((None, 8, W), prev_map),
                pl.BlockSpec((None, 8, W), next_map),
            ],
            out_specs=pl.BlockSpec((None, TH, W), cur_map),
        ),
        compiler_params=pltpu.CompilerParams(
            dimension_semantics=("parallel", "parallel")),
        cost_estimate=cost,
    )(x3, x3, x3)
    # TODO(synk): for W far below 128 the lane occupancy is W/128; a lane-dense
    # repack (folding rows into lanes) would need neighbor-aware masking.
    return out.reshape(N, 1, H, W)


def _reference(x):
    # Pure-JAX reference of the PyTorch forward for correctness checks.
    xp = jnp.pad(x, ((0, 0), (0, 0), (1, 1), (1, 1)))
    x_v = xp[:, :, 2:, 1:-1] - xp[:, :, :-2, 1:-1]
    x_h = xp[:, :, 1:-1, 2:] - xp[:, :, 1:-1, :-2]
    return jnp.sqrt(x_v ** 2 + x_h ** 2 + 1e-6)


if __name__ == "__main__":
    key = jax.random.PRNGKey(0)

    # Primary test: (N, 1, H, W) like the module expects.
    x = jax.random.normal(key, (2, 1, 16, 16), dtype=jnp.float32)
    out = get_gradient(x)
    jax.block_until_ready(out)
    ref = _reference(x)
    assert out.shape == (2, 1, 16, 16)
    assert jnp.allclose(out, ref, atol=1e-5, rtol=1e-5)

    # Secondary test: forces multi-tile rows + partial last tile (exercises halos/masks).
    x2 = jax.random.normal(jax.random.PRNGKey(1), (1, 1, 37, 24), dtype=jnp.float32)
    out2 = get_gradient(x2, tile_rows=8)
    jax.block_until_ready(out2)
    assert jnp.allclose(out2, _reference(x2), atol=1e-5, rtol=1e-5)

    print("KERNEL_OK")
</pallas_src>

<mosaic_0001>
module attributes {stable_mosaic.version = 11 : i64} {
  func.func @_get_gradient_kernel(%arg0: i32, %arg1: i32, %arg2: memref<1x16x16xf32, #tpu.memory_space<vmem>>, %arg3: memref<1x8x16xf32, #tpu.memory_space<vmem>>, %arg4: memref<1x8x16xf32, #tpu.memory_space<vmem>>, %arg5: memref<1x16x16xf32, #tpu.memory_space<vmem>>) attributes {dimension_semantics = [#tpu.dimension_semantics<parallel>, #tpu.dimension_semantics<parallel>], iteration_bounds = array<i64: 2, 1>, scalar_prefetch = 0 : i64, scratch_operands = 0 : i64, tpu.core_type = #tpu.core_type<tc>, window_params = [{transform_indices = @transform_0, window_bounds = array<i64: 1, 16, 16>}, {transform_indices = @transform_1, window_bounds = array<i64: 1, 8, 16>}, {transform_indices = @transform_2, window_bounds = array<i64: 1, 8, 16>}, {transform_indices = @transform_3, window_bounds = array<i64: 1, 16, 16>}]} {
    %c0 = arith.constant 0 : index
    %c0_0 = arith.constant 0 : index
    %c0_1 = arith.constant 0 : index
    %0 = vector.load %arg2[%c0, %c0_0, %c0_1] : memref<1x16x16xf32, #tpu.memory_space<vmem>>, vector<1x16x16xf32>
    %1 = vector.shape_cast %0 : vector<1x16x16xf32> to vector<16x16xf32>
    %c0_2 = arith.constant 0 : index
    %c7 = arith.constant 7 : index
    %c0_3 = arith.constant 0 : index
    %2 = vector.load %arg3[%c0_2, %c7, %c0_3] : memref<1x8x16xf32, #tpu.memory_space<vmem>>, vector<1x1x16xf32>
    %3 = vector.shape_cast %2 : vector<1x1x16xf32> to vector<1x16xf32>
    %c0_4 = arith.constant 0 : index
    %c0_5 = arith.constant 0 : index
    %c0_6 = arith.constant 0 : index
    %4 = vector.load %arg4[%c0_4, %c0_5, %c0_6] : memref<1x8x16xf32, #tpu.memory_space<vmem>>, vector<1x1x16xf32>
    %5 = vector.shape_cast %4 : vector<1x1x16xf32> to vector<1x16xf32>
    %6 = tpu.iota {dimensions = array<i32: 0>} : vector<16x16xi32>
    %7 = tpu.iota {dimensions = array<i32: 1>} : vector<16x16xi32>
    %c16_i32 = arith.constant 16 : i32
    %8 = arith.muli %arg1, %c16_i32 : i32
    %9 = vector.broadcast %8 : i32 to vector<16x16xi32>
    %10 = arith.addi %6, %9 : vector<16x16xi32>
    %c15_i32 = arith.constant 15 : i32
    %11 = tpu.dynamic_rotate %1 by %c15_i32 dim 0 : vector<16x16xf32>, i32 -> vector<16x16xf32>
    %c15_i32_7 = arith.constant 15 : i32
    %12 = vector.broadcast %c15_i32_7 : i32 to vector<16x16xi32>
    %13 = arith.cmpi eq, %6, %12 : vector<16x16xi32>
    %14 = vector.shape_cast %5 : vector<1x16xf32> to vector<1x16xf32>
    %15 = vector.broadcast %14 : vector<1x16xf32> to vector<16x16xf32>
    %16 = arith.select %13, %15, %11 : vector<16x16xi1>, vector<16x16xf32>
    %c15_i32_8 = arith.constant 15 : i32
    %17 = vector.broadcast %c15_i32_8 : i32 to vector<16x16xi32>
    %18 = arith.cmpi eq, %10, %17 : vector<16x16xi32>
    %cst = arith.constant 0.000000e+00 : f32
    %19 = vector.broadcast %cst : f32 to vector<16x16xf32>
    %20 = arith.select %18, %19, %16 : vector<16x16xi1>, vector<16x16xf32>
    %c1_i32 = arith.constant 1 : i32
    %21 = tpu.dynamic_rotate %1 by %c1_i32 dim 0 : vector<16x16xf32>, i32 -> vector<16x16xf32>
    %c0_i32 = arith.constant 0 : i32
    %22 = vector.broadcast %c0_i32 : i32 to vector<16x16xi32>
    %23 = arith.cmpi eq, %6, %22 : vector<16x16xi32>
    %24 = vector.shape_cast %3 : vector<1x16xf32> to vector<1x16xf32>
    %25 = vector.broadcast %24 : vector<1x16xf32> to vector<16x16xf32>
    %26 = arith.select %23, %25, %21 : vector<16x16xi1>, vector<16x16xf32>
    %c0_i32_9 = arith.constant 0 : i32
    %27 = vector.broadcast %c0_i32_9 : i32 to vector<16x16xi32>
    %28 = arith.cmpi eq, %10, %27 : vector<16x16xi32>
    %cst_10 = arith.constant 0.000000e+00 : f32
    %29 = vector.broadcast %cst_10 : f32 to vector<16x16xf32>
    %30 = arith.select %28, %29, %26 : vector<16x16xi1>, vector<16x16xf32>
    %c15_i32_11 = arith.constant 15 : i32
    %31 = vector.broadcast %c15_i32_11 : i32 to vector<16x16xi32>
    %32 = arith.cmpi eq, %7, %31 : vector<16x16xi32>
    %c15_i32_12 = arith.constant 15 : i32
    %33 = tpu.dynamic_rotate %1 by %c15_i32_12 dim 1 : vector<16x16xf32>, i32 -> vector<16x16xf32>
    %cst_13 = arith.constant 0.000000e+00 : f32
    %34 = vector.broadcast %cst_13 : f32 to vector<16x16xf32>
    %35 = arith.select %32, %34, %33 : vector<16x16xi1>, vector<16x16xf32>
    %c0_i32_14 = arith.constant 0 : i32
    %36 = vector.broadcast %c0_i32_14 : i32 to vector<16x16xi32>
    %37 = arith.cmpi eq, %7, %36 : vector<16x16xi32>
    %c1_i32_15 = arith.constant 1 : i32
    %38 = tpu.dynamic_rotate %1 by %c1_i32_15 dim 1 : vector<16x16xf32>, i32 -> vector<16x16xf32>
    %cst_16 = arith.constant 0.000000e+00 : f32
    %39 = vector.broadcast %cst_16 : f32 to vector<16x16xf32>
    %40 = arith.select %37, %39, %38 : vector<16x16xi1>, vector<16x16xf32>
    %41 = arith.subf %20, %30 : vector<16x16xf32>
    %42 = arith.subf %35, %40 : vector<16x16xf32>
    %43 = arith.mulf %41, %41 : vector<16x16xf32>
    %44 = arith.mulf %42, %42 : vector<16x16xf32>
    %45 = arith.addf %43, %44 : vector<16x16xf32>
    %cst_17 = arith.constant 9.99999997E-7 : f32
    %46 = vector.broadcast %cst_17 : f32 to vector<16x16xf32>
    %47 = arith.addf %45, %46 : vector<16x16xf32>
    %48 = math.sqrt %47 : vector<16x16xf32>
    %c0_18 = arith.constant 0 : index
    %c0_19 = arith.constant 0 : index
    %c0_20 = arith.constant 0 : index
    %49 = vector.load %arg5[%c0_18, %c0_19, %c0_20] : memref<1x16x16xf32, #tpu.memory_space<vmem>>, vector<1x16x16xf32>
    %50 = vector.shape_cast %49 : vector<1x16x16xf32> to vector<16x16xf32>
    %51 = vector.shape_cast %48 : vector<16x16xf32> to vector<1x16x16xf32>
    tpu.vector_store %arg5[%c0_18, %c0_19, %c0_20], %51 {strides = array<i32>} : memref<1x16x16xf32, #tpu.memory_space<vmem>>, vector<1x16x16xf32>,
    return
  }
  func.func @transform_0(%arg0: i32, %arg1: i32) -> (i32, i32, i32) {
    %c0_i32 = arith.constant 0 : i32
    %c0_i32_0 = arith.constant 0 : i32
    return %arg0, %arg1, %c0_i32 : i32, i32, i32
  }
  func.func @transform_1(%arg0: i32, %arg1: i32) -> (i32, i32, i32) {
    %c2_i32 = arith.constant 2 : i32
    %0 = arith.muli %arg1, %c2_i32 : i32
    %c1_i32 = arith.constant 1 : i32
    %1 = arith.subi %0, %c1_i32 : i32
    %c0_i32 = arith.constant 0 : i32
    %2 = arith.maxsi %1, %c0_i32 : i32
    %c0_i32_0 = arith.constant 0 : i32
    %c0_i32_1 = arith.constant 0 : i32
    return %arg0, %2, %c0_i32_0 : i32, i32, i32
  }
  func.func @transform_2(%arg0: i32, %arg1: i32) -> (i32, i32, i32) {
    %c1_i32 = arith.constant 1 : i32
    %0 = arith.addi %arg1, %c1_i32 : i32
    %c2_i32 = arith.constant 2 : i32
    %1 = arith.muli %0, %c2_i32 : i32
    %c1_i32_0 = arith.constant 1 : i32
    %2 = arith.minsi %1, %c1_i32_0 : i32
    %c0_i32 = arith.constant 0 : i32
    %c0_i32_1 = arith.constant 0 : i32
    return %arg0, %2, %c0_i32 : i32, i32, i32
  }
  func.func @transform_3(%arg0: i32, %arg1: i32) -> (i32, i32, i32) {
    %c0_i32 = arith.constant 0 : i32
    %c0_i32_0 = arith.constant 0 : i32
    return %arg0, %arg1, %c0_i32 : i32, i32, i32
  }
}

</mosaic_0001>

<bundles_post_ra>
// kernel: tpu_custom_call.1
= control target key start
LH: loop header
LB: loop body
LE: loop exit
PB: predicated region body
PF: predicated region fallthrough
CT: control target
= control target key end

     0   :  { %s1173_s0 = inlined_call_operand.hbm [shape: f32[2,16,16], index: 0, kind: input, shape index: {}]   ;;  %s1174_s1 = inlined_call_operand.hbm [shape: f32[2,16,16], index: 1, kind: input, shape index: {}]   ;;  %s1175_s2 = inlined_call_operand.hbm [shape: f32[2,16,16], index: 2, kind: input, shape index: {}]   ;;  %s1176_s3 = inlined_call_operand.hbm [shape: f32[2,16,16], index: 3, kind: output, shape index: {}]  }
   0x1   :  { %1183 = sst [smem:[#allocation15_spill]] %s1173_s0 }
   0x2   :  { %1184 = sst [smem:[#allocation16_spill]] %s1174_s1 }
   0x3   :  { %8 = vsyncpa [#allocation3], 0 }
   0x4   :  { %10 = vsyncpa [#allocation3 + $0x1], 0 }
   0x5   :  { %11 = vsyncpa [#allocation6], 0 }
   0x6   :  { %13 = vsyncpa [#allocation6 + $0x1], 0 }
   0x7   :  { %14 = vsyncpa [#allocation4], 0 }
   0x8   :  { %16 = vsyncpa [#allocation4 + $0x1], 0  ;;  %s902_s12 = smov 0   ;;  %s904_s13 = smov 0  }
   0x9   :  { %s906_s14 = smov 0   ;;  %s908_s15 = smov 0  }
   0xa   :  { %s910_s16 = smov 0   ;;  %s912_s17 = smov 0  }
   0xb LB: > { %1185 = sst [smem:[#allocation12_spill]] %s865_s16  ;;  %s933_s18 = sadd.s32 4294967295, %s869_s17   ;;  %s869_s17 = sphi %s912_s17, %s22_s17   ;;  %s865_s16 = sphi %s910_s16, %s1206_s16   ;;  %s861_s15 = sphi %s908_s15, %s1205_s15   ;;  %s857_s14 = sphi %s906_s14, %s1209_s14   ;;  %s853_s13 = sphi %s904_s13, %s1208_s13   ;;  %s849_s12 = sphi %s902_s12, %s1207_s12  }
   0xc   : > { %s580_s19 = sadd.s32 4294967294, %s869_s17   ;;  %s34_s20 = sadd.s32 1, %s865_s16 }
   0xd   : > { %s43_s21 = sadd.s32 1, %s857_s14  ;;  %p36_p0 = scmp.ge.s32.totalorder %s34_s20, 2 }
   0xe   : > { %p50_p1 = scmp.ne.s32.totalorder %s857_s14, %s853_s13  ;;  %p51_p2 = scmp.eq.s32.totalorder %s869_s17, 0 }
   0xf   : > { %p56_p3 = scmp.ne.s32.totalorder %s853_s13, %s849_s12  ;;  %s1211_s20 = smov (%p36_p0, %s34_s20), 0 }
  0x10   : > { %1186 = sst [smem:[#allocation13_spill]] %s1211_s20  ;;  %p945_p4 = por %p51_p2, %p50_p1 }
  0x11   : > { %p57_p5 = scmp.eq.s32.totalorder %s933_s18, 0  ;;  %s38_s23 = ssub.s32 %s865_s16, %s1211_s20 }
  0x12   : > { %p154_p6 = scmp.eq.s32.totalorder %s933_s18, 1  ;;  %p41_p7 = scmp.eq.s32.totalorder %s38_s23, 0 }
  0x13   : > { %p953_p8 = por %p57_p5, %p56_p3  ;;  %p160_p10 = scmp.eq.s32.totalorder %s580_s19, 1 }
  0x14   : > { %p957_p9 = por %p154_p6, %p50_p1  ;;  %p632_p13 = scmp.lt.s32.totalorder %s869_s17, 2 }
  0x15   : > { %s1188_s24 = scalar_select %p953_p8, 1, 0 }
  0x16   : > { %s1189_s25 = scalar_select %p957_p9, 1, 0 }
  0x17   : > { %s962_s26 = scalar_select %p41_p7, %s857_s14, %s43_s21  }
  0x18   : > { %p964_p11 = por %p160_p10, %p56_p3  ;;  %s971_s28 = sand.u32 1, %s857_s14  }
  0x19   : > { %1190 = sst [smem:[#allocation14_spill]] %s962_s26  ;;  %s974_s29 = sshll.u32 %s865_s16, 8 }
  0x1a   : > { %s1191_s27 = scalar_select %p964_p11, 1, 0 }
  0x1b   : > { %s203_s30 = sand.u32 1, %s869_s17   ;;  %s1192_s0 = sld [smem:[#allocation15_spill]] }
  0x1c   : > { %p985_p0 = pnand %p632_p13, %p945_p4  ;;  %s1177_s8 = sshll.u32 %s971_s28, 3 }
  0x1d   : > { %s1194_s1 = sld [smem:[#allocation16_spill]]  ;;  %s207_s19 = scalar_lea.vmem [#allocation5], %s1177_s8 }
  0x1e   : > { %s1193_s7 = scalar_select %p985_p0, 1, 0 }
  0x1f   : > { %s220_s21 = sshll.u32 %s207_s19, 4  ;;  %s1000_s22 = scalar_lea.sflag [#allocation6], %s203_s30  ;;  %s998_s21 = int_to_ptr.vmem [resolvable:$true] %s220_s21 }
  0x20   : > { %p1006_p2 = pneg %p985_p0 }
  0x21   : > { %s981_s6 = scalar_lea.hbm %s1192_s0, %s974_s29 }
  0x23   : > { %s994_s11 = scalar_lea.hbm %s1194_s1, %s974_s29  ;;  %s698_s10 = scalar_lea.hbm %s1194_s1, 512 }
  0x24   : > { %s693_s23 = scalar_lea.hbm %s994_s11, 128  ;;  %p699_p5 = scmp.lt.u32.totalorder %s994_s11, %s1194_s1 }
  0x25   : > { %p694_p1 = scmp.ne.s32.totalorder %s994_s11, %s693_s23  ;;  %p700_p6 = scmp.lt.u32.totalorder %s698_s10, %s693_s23 }
  0x26   : > { %p702_p10 = scmp.lt.u32.totalorder %s693_s23, %s994_s11 }
  0x27   : > { %p696_p3 = pnand %p1006_p2, %p694_p1  ;;  %p701_p7 = por %p700_p6, %p699_p5 }
  0x29   : > { %p697_p4 = pneg %p696_p3  ;;  %p703_p13 = por %p702_p10, %p701_p7 }
  0x2b   : > { %p704_p12 = pnand %p703_p13, %p697_p4 }
  0x2d   : > { %707 = shalt.err (!%p704_p12)
}
  0x2e   : > { %s708_s30 = scalar_lea.vmem %s998_s21, 128  ;;  %s871_s5 = smov [#allocation5]  }
  0x2f   : > { %p709_p1 = scmp.ne.s32.totalorder %s998_s21, %s708_s30  ;;  %s713_s9 = sshll.u32 %s871_s5, 4  ;;  %s714_s9 = int_to_ptr.vmem [resolvable:$false] %s713_s9 }
  0x30   : > { %s715_s8 = scalar_lea.vmem %s714_s9, 256  ;;  %p716_p9 = scmp.lt.s32.totalorder %s998_s21, %s714_s9 }
  0x31   : > { %p711_p3 = pnand %p709_p1, %p1006_p2  ;;  %p717_p8 = scmp.lt.s32.totalorder %s715_s8, %s708_s30 }
  0x33   : > { %p712_p11 = pneg %p711_p3  ;;  %p718_p5 = por %p717_p8, %p716_p9 }
  0x35   : > { %p719_p6 = pnand %p718_p5, %p712_p11 }
  0x37   : > { %722 = shalt.err (!%p719_p6)
}
  0x38   : > { %624 = dma.hbm_to_vmem [thread:$0]  (!%p985_p0), %s994_s11, 128, %s998_s21, %s1000_s22  }
  0x39   : > { %p592_p12 = scmp.ge.s32.totalorder %s869_s17, 1  ;;  %p249_p4 = scmp.lt.s32.totalorder %s869_s17, 3 }
  0x3a   : > { %s583_s10 = sshll.u32 %s971_s28, 4  ;;  %s607_s5 = sadd.s32 128, %s974_s29 }
  0x3b   : > { %p1032_p8 = pnand %p592_p12, %p249_p4  ;;  %s184_s19 = scalar_lea.vmem [#allocation2], %s583_s10 }
  0x3c   : > { %s193_s30 = sshll.u32 %s184_s19, 4  ;;  %s1043_s1 = scalar_lea.hbm %s1175_s2, %s607_s5  ;;  %s1038_s30 = int_to_ptr.vmem [resolvable:$true] %s193_s30 }
  0x3d   : > { %s1196_s23 = scalar_select %p1032_p8, 1, 0 }
  0x3e   : > { %s181_s11 = scalar_lea.sflag [#allocation3], %s971_s28  ;;  %s723_s21 = scalar_lea.hbm %s981_s6, 256 }
  0x3f   : > { %p724_p9 = scmp.ne.s32.totalorder %s981_s6, %s723_s21  ;;  %s728_s26 = scalar_lea.hbm %s1192_s0, 512 }
  0x40   : > { %p729_p10 = scmp.lt.u32.totalorder %s981_s6, %s1192_s0  ;;  %p730_p13 = scmp.lt.u32.totalorder %s728_s26, %s723_s21 }
  0x41   : > { %p726_p11 = pnand %p724_p9, %p1006_p2  ;;  %p732_p3 = scmp.lt.u32.totalorder %s723_s21, %s981_s6 }
  0x42   : > { %p731_p1 = por %p730_p13, %p729_p10 }
  0x43   : > { %p727_p7 = pneg %p726_p11 }
  0x44   : > { %p733_p5 = por %p732_p3, %p731_p1 }
  0x46   : > { %p734_p6 = pnand %p733_p5, %p727_p7 }
  0x48   : > { %737 = shalt.err (!%p734_p6)
}
  0x49   : > { %s738_s29 = scalar_lea.vmem %s1038_s30, 256  ;;  %s872_s16 = smov [#allocation2]  }
  0x4a   : > { %p739_p12 = scmp.ne.s32.totalorder %s1038_s30, %s738_s29  ;;  %s743_s20 = sshll.u32 %s872_s16, 4  ;;  %s744_s20 = int_to_ptr.vmem [resolvable:$false] %s743_s20 }
  0x4b   : > { %s745_s5 = scalar_lea.vmem %s744_s20, 512  ;;  %p746_p11 = scmp.lt.s32.totalorder %s1038_s30, %s744_s20 }
  0x4c   : > { %p741_p4 = pnand %p739_p12, %p1006_p2  ;;  %p747_p8 = scmp.lt.s32.totalorder %s745_s5, %s738_s29 }
  0x4e   : > { %p742_p9 = pneg %p741_p4  ;;  %p748_p10 = por %p747_p8, %p746_p11 }
  0x50   : > { %p749_p13 = pnand %p748_p10, %p742_p9 }
  0x52   : > { %752 = shalt.err (!%p749_p13)
}
  0x53   : > { %s873_s26 = smov 128   ;;  %s874_s9 = smov 8  }
  0x54   : > { %621 = dma.hbm_to_vmem [thread:$0]  (!%p985_p0), %s981_s6, 256, %s1038_s30, %s181_s11, %s873_s26, %s873_s26, %s874_s9  }
  0x55   : > { %s1197_s8 = sshll.u32 %s971_s28, 3  ;;  %s753_s19 = scalar_lea.hbm %s1043_s1, 128 }
  0x56   : > { %s231_s21 = scalar_lea.vmem [#allocation7], %s1197_s8  ;;  %p754_p8 = scmp.ne.s32.totalorder %s1043_s1, %s753_s19 }
  0x57   : > { %s244_s10 = sshll.u32 %s231_s21, 4  ;;  %s758_s20 = scalar_lea.hbm %s1175_s2, 512  ;;  %s245_s10 = int_to_ptr.vmem [resolvable:$true] %s244_s10 }
  0x58   : > { %p756_p7 = pnand %p754_p8, %p1006_p2  ;;  %p759_p3 = scmp.lt.u32.totalorder %s1043_s1, %s1175_s2 }
  0x59   : > { %p760_p5 = scmp.lt.u32.totalorder %s758_s20, %s753_s19  ;;  %p762_p12 = scmp.lt.u32.totalorder %s753_s19, %s1043_s1 }
  0x5a   : > { %p757_p1 = pneg %p756_p7 }
  0x5b   : > { %p761_p6 = por %p760_p5, %p759_p3 }
  0x5d   : > { %p763_p4 = por %p762_p12, %p761_p6 }
  0x5f   : > { %p764_p9 = pnand %p763_p4, %p757_p1 }
  0x61   : > { %767 = shalt.err (!%p764_p9)
}
  0x62   : > { %s768_s28 = scalar_lea.vmem %s245_s10, 128  ;;  %s875_s6 = smov [#allocation7]  }
  0x63   : > { %p769_p11 = scmp.ne.s32.totalorder %s245_s10, %s768_s28  ;;  %s773_s30 = sshll.u32 %s875_s6, 4  ;;  %s774_s30 = int_to_ptr.vmem [resolvable:$false] %s773_s30 }
  0x64   : > { %s775_s11 = scalar_lea.vmem %s774_s30, 256  ;;  %p776_p8 = scmp.lt.s32.totalorder %s245_s10, %s774_s30 }
  0x65   : > { %p771_p10 = pnand %p769_p11, %p1006_p2  ;;  %p777_p7 = scmp.lt.s32.totalorder %s775_s11, %s768_s28 }
  0x67   : > { %p772_p13 = pneg %p771_p10  ;;  %p778_p0 = por %p777_p7, %p776_p8 }
  0x69   : > { %p779_p3 = pnand %p778_p0, %p772_p13 }
  0x6b   : > { %782 = shalt.err (!%p779_p3)
}
  0x6c   : > { %p1198_p5 = scmp.ne.s32.totalorder %s1193_s7, 0  ;;  %p1199_p1 = scmp.ne.s32.totalorder %s1196_s23, 0 }
  0x6d   : > { %s1092_s0 = sand.u32 (!%p1199_p1), 1, %s853_s13   ;;  %p1200_p0 = scmp.ne.s32.totalorder (!%p1199_p1), %s1188_s24, 0 }
  0x6e   : > { %627 = dma.hbm_to_vmem [thread:$0]  (!%p1198_p5), %s1043_s1, 128, %s245_s10, %s1000_s22  }
  0x6f   : > { %253 = sbr.rel (%p1199_p1) target bundleno = 517 (0x205), region = 32  ;;  %s593_s4 = sshll.u32 (!%p1199_p1), %s1092_s0, 4 }
  0x70   : > { %s256_s26 = scalar_lea.sflag (!%p1199_p1), [#allocation3], %s1092_s0  ;;  %s259_s9 = scalar_lea.vmem (!%p1199_p1), [#allocation2], %s593_s4 }
  0x76   : > { %836 = dma.done.wait (%p1200_p0), %s256_s26, 256  }
  0x77   : > { %838 = vsyncadd (%p1200_p0), %s256_s26, 4294967040  ;;  %s264_s1 = sand.u32 1, %s933_s18   ;;  %s594_s7 = sshll.u32 %s1092_s0, 3 }
  0x78   : > { %s265_s22 = scalar_lea.sflag [#allocation6], %s264_s1  ;;  %s268_s23 = scalar_lea.vmem [#allocation5], %s594_s7 }
  0x79   : > { %840 = dma.done.wait (%p1200_p0), %s265_s22, 256  }
  0x7a   : > { %842 = vsyncadd (%p1200_p0), %s265_s22, 4294967040  ;;  %v320_v0 = vld [vmem:[%s259_s9] sm:$0xff]  ;;  %s876_s8 = smov 16   ;;  %v321_v1 = vld [vmem:[%s259_s9 + $0x8] sm:$0xff]  ;;  %vm368_vm0 = vcmask 1047680   ;;  %s877_s18 = smov 127   ;;  %v324_v10 = vlaneseq }
  0x7b   : > { %369 = vrot.lane.b32.xlu0 %v320_v0, %s876_s8  ;;  %s878_s24 = smov 113   ;;  %v350_v12 = vrot.slane %v320_v0, 7  ;;  %v351_v13 = vrot.slane %v321_v1, 7  ;;  %v598_v14 = vld [vmem:[%s268_s23 + $0x7] ss:$0 sm:$0xff]  ;;  %v334_v17 = vrot.slane %v321_v1, 1 }
  0x7c   : > { %v325_v11 = vshrl.u32 %v324_v10, 7  ;;  %v333_v18 = vrot.slane %v320_v0, 1  ;;  %s277_s21 = scalar_lea.vmem [#allocation7], %s594_s7  ;;  %v328_v22 = vand.u32 127, %v324_v10  ;;  %vm426_vm8 = vcmask 130048   ;;  %s608_s10 = sshll.u32 %s861_s15, 8 }
  0x7d   : > { %v597_v20 = vld [vmem:[%s277_s21] ss:$0 sm:$0xff]  ;;  %s309_s19 = scalar_lea.vmem [#allocation8], %s593_s4  ;;  %s1121_s5 = scalar_lea.hbm %s1176_s3, %s608_s10 }
  0x7e   : > { %vm352_vm1 = vcmp.lt.s32.totalorder %v325_v11, 1  ;;  %vm355_vm2 = vcmp.eq.s32.totalorder %v325_v11, 0  ;;  %v326_v16 = vadd.s32 8, %v325_v11  ;;  %vm335_vm3 = vcmp.lt.s32.totalorder %v325_v11, 7  ;;  %s445_s29 = sshll.u32 %s309_s19, 4  ;;  %s430_s15 = scalar_lea.sflag [#allocation4], %s1092_s0  ;;  %s1123_s29 = int_to_ptr.vmem [resolvable:$true] %s445_s29 }
  0x7f   : > { %372 = vrot.lane.b32.xlu0 %v321_v1, %s876_s8  ;;  %v354_v15 = vsel %vm352_vm1, %v351_v13, %v350_v12  ;;  %v337_v21 = vsel %vm335_vm3, %v334_v17, %v333_v18  ;;  %v336_v23 = vsel %vm335_vm3, %v333_v18, %v334_v17  ;;  %vm367_vm5 = vcmp.eq.s32.totalorder %v328_v22, 15  ;;  %s783_s28 = scalar_lea.vmem %s1123_s29, 256  ;;  %p1201_p6 = scmp.ne.s32.totalorder %s1189_s25, 0 }
  0x80   : > { %v361_v19 = vsel %vm355_vm2, %v598_v14, %v354_v15  ;;  %vm339_vm4 = vcmp.eq.s32.totalorder %v326_v16, 15  ;;  %vm391_vm6 = vcmp.eq.s32.totalorder %v328_v22, 0  ;;  %v353_v29 = vsel %vm352_vm1, %v350_v12, %v351_v13  ;;  %p784_p2 = scmp.ne.s32.totalorder %s1123_s29, %s783_s28  ;;  %s879_s6 = smov [#allocation8]  }
  0x81   : > { %v365_v24 = vsel %vm355_vm2, 0.0, %v361_v19  ;;  %v345_v26 = vsel %vm339_vm4, %v597_v20, %v337_v21  ;;  %s787_s30 = sshll.u32 %s879_s6, 4  ;;  %s788_s30 = int_to_ptr.vmem [resolvable:$false] %s787_s30 }
  0x82   : > { %v400_v27 = vsub.f32 %v336_v23, %v365_v24  ;;  %v349_v28 = vsel %vm339_vm4, 0.0, %v345_v26  ;;  %p785_p12 = pnand %p784_p2, %p1201_p6  ;;  %s789_s11 = scalar_lea.vmem %s788_s30, 512 }
  0x83   : > { %v401_v36 = vsub.f32 %v349_v28, %v353_v29  ;;  %p790_p9 = scmp.lt.s32.totalorder %s1123_s29, %s788_s30  ;;  %p791_p11 = scmp.lt.s32.totalorder %s789_s11, %s783_s28 }
  0x84   : > { %v404_v35 = vmul.f32 %v400_v27, %v400_v27  ;;  %p786_p4 = pneg %p785_p12 }
  0x85   : > { %v405_v43 = vmul.f32 %v401_v36, %v401_v36  ;;  %p792_p10 = por %p791_p11, %p790_p9 }
  0x87   : > { %p793_p13 = pnand %p792_p10, %p786_p4 }
  0xed   : > { %v370_v2 = vpop.permute.xlu0 %369 }
  0xee   : > { %v371_v3 = vsel %vm368_vm0, %v370_v2, %v320_v0 }
  0xef   : > { %375 = vrot.lane.b32.xlu1 %v371_v3, %s876_s8 }
  0xf1   : > { %v373_v4 = vpop.permute.xlu0 %372 }
  0xf2   : > { %v374_v5 = vsel %vm368_vm0, %v373_v4, %v321_v1 }
  0xf3   : > { %377 = vrot.lane.b32.xlu1 %v374_v5, %s876_s8 }
 0x161   : > { %v376_v6 = vpop.permute.xlu1 %375 }
 0x162   : > { %v379_v7 = vsel %vm368_vm0, %v376_v6, %v320_v0 }
 0x163   : > { %383 = vrot.lane.b32.xlu0 %v379_v7, %s877_s18 }
 0x165   : > { %v378_v8 = vpop.permute.xlu1 %377 }
 0x166   : > { %v380_v9 = vsel %vm368_vm0, %v378_v8, %v321_v1 }
 0x167   : > { %392 = vrot.lane.b32.xlu0 %v379_v7, %s878_s24  ;;  %385 = vrot.lane.b32.xlu1 %v380_v9, %s877_s18 }
 0x16b   : > { %394 = vrot.lane.b32.xlu1 %v380_v9, %s878_s24 }
 0x1d5   : > { %v384_v25 = vpop.permute.xlu0 %383 }
 0x1d6   : > { %v389_v32 = vsel %vm367_vm5, 0.0, %v384_v25 }
 0x1d9   : > { %v386_v30 = vpop.permute.xlu1 %385  ;;  %v393_v31 = vpop.permute.xlu0 %392 }
 0x1da   : > { %v398_v33 = vsel %vm391_vm6, 0.0, %v393_v31  ;;  %v390_v39 = vsel %vm367_vm5, 0.0, %v386_v30 }
 0x1db   : > { %v402_v34 = vsub.f32 %v389_v32, %v398_v33 }
 0x1dd   : > { %v406_v37 = vmul.f32 %v402_v34, %v402_v34  ;;  %v395_v38 = vpop.permute.xlu1 %394 }
 0x1de   : > { %v399_v40 = vsel %vm391_vm6, 0.0, %v395_v38 }
 0x1df   : > { %v408_v41 = vadd.f32 %v406_v37, %v404_v35  ;;  %v403_v42 = vsub.f32 %v390_v39, %v399_v40 }
 0x1e1   : > { %v410_v44 = vadd.f32 1e-06, %v408_v41  ;;  %v407_v45 = vmul.f32 %v403_v42, %v403_v42 }
 0x1e3   : > { %689 = vrsqrt.f32 %v410_v44  ;;  %v409_v46 = vadd.f32 %v407_v45, %v405_v43  ;;  %vm414_vm7 = vcmp.eq.f32.partialorder %v410_v44, inf  ;;  %v417_v50 = vand.u32 2147483648, %v410_v44 }
 0x1e4   : > { %vm416_vm9 = vcmp.eq.f32.partialorder %v410_v44, 0.0 }
 0x1e5   : > { %v411_v47 = vadd.f32 1e-06, %v409_v46 }
 0x1e7   : > { %691 = vrsqrt.f32 %v411_v47  ;;  %vm421_vm10 = vcmp.eq.f32.partialorder %v411_v47, inf  ;;  %v424_v55 = vand.u32 2147483648, %v411_v47  ;;  %vm423_vm11 = vcmp.eq.f32.partialorder %v411_v47, 0.0 }
 0x1ed   : > { %v690_v48 = vpop.eup %689 }
 0x1ee   : > { %v413_v49 = vmul.f32 %v690_v48, %v410_v44 }
 0x1f0   : > { %v415_v51 = vsel %vm414_vm7, %v410_v44, %v413_v49 }
 0x1f1   : > { %v692_v52 = vpop.eup %691  ;;  %v418_v53 = vsel %vm416_vm9, %v417_v50, %v415_v51 }
 0x1f2   : > { %v420_v54 = vmul.f32 %v692_v52, %v411_v47  ;;  %427 = vst.msk [vmem:[%s309_s19] sm:$0xff] %vm426_vm8, %v418_v53 }
 0x1f4   : > { %v422_v56 = vsel %vm421_vm10, %v411_v47, %v420_v54 }
 0x1f5   : > { %v425_v57 = vsel %vm423_vm11, %v424_v55, %v422_v56 }
 0x1f6   : > { %428 = vst.msk [vmem:[%s309_s19 + $0x8] sm:$0xff] %vm426_vm8, %v425_v57 }
 0x1f7   : > { %796 = shalt.err (!%p793_p13)
}
 0x1f8   : > { %s797_s4 = scalar_lea.hbm %s1121_s5, 256  ;;  %s801_s1 = scalar_lea.hbm %s1176_s3, 512 }
 0x1f9   : > { %p798_p8 = scmp.ne.s32.totalorder %s1121_s5, %s797_s4  ;;  %p802_p5 = scmp.lt.u32.totalorder %s1121_s5, %s1176_s3 }
 0x1fa   : > { %p803_p1 = scmp.lt.u32.totalorder %s801_s1, %s797_s4  ;;  %p805_p2 = scmp.lt.u32.totalorder %s797_s4, %s1121_s5 }
 0x1fb   : > { %p799_p7 = pnand %p798_p8, %p1201_p6 }
 0x1fc   : > { %p804_p0 = por %p803_p1, %p802_p5 }
 0x1fd   : > { %p800_p3 = pneg %p799_p7 }
 0x1fe   : > { %p806_p12 = por %p805_p2, %p804_p0 }
 0x200   : > { %p807_p4 = pnand %p806_p12, %p800_p3 }
 0x202   : > { %810 = shalt.err (!%p807_p4)
}
 0x203   : > { %s880_s23 = smov 128   ;;  %s881_s8 = smov 8  }
 0x204   : > { %616 = dma.vmem_to_hbm [thread:$0]  (%p1201_p6), %s1123_s29, 256, %s1121_s5, %s430_s15, %s880_s23, %s880_s23, %s881_s8  }
 0x205 PF: > { %s460_s18 = sand.u32 1, %s849_s12   ;;  %p1202_p9 = scmp.ne.s32.totalorder %s1191_s27, 0 }
 0x206   : > { %p1203_p11 = scmp.ge.s32.totalorder %s869_s17, 2  ;;  %s461_s24 = scalar_lea.sflag [#allocation4], %s460_s18 }
 0x208   : > { %p629_p10 = pnand %p1203_p11, %p1202_p9 }
 0x20a   : > { %844 = dma.done.wait (!%p629_p10), %s461_s24, 256  }
 0x20b   : > { %846 = vsyncadd (!%p629_p10), %s461_s24, 4294967040  ;;  %s22_s17 = sadd.s32 1, %s869_s17   ;;  %s1204_s21 = sld [smem:[#allocation14_spill]] }
 0x20c   : > { %p19_p13 = scmp.ge.s32.totalorder %s22_s17, 4   ;;  %s1205_s15 = sld [smem:[#allocation12_spill]] }
 0x20d   : > { %s1206_s16 = sld [smem:[#allocation13_spill]]  ;;  %s1207_s12 = smov %s853_s13 }
 0x20e   : > { %s1208_s13 = smov %s857_s14  ;;  %21 = sbr.rel (!%p19_p13) target bundleno = 11 (0xb), region = 101 }
 0x211   : > { %s1209_s14 = smov %s1204_s21 }
 0x215   :  { %466 = vsyncpa [#allocation3], 1 }
 0x216   :  { %468 = vsyncpa [#allocation3 + $0x1], 1 }
 0x217   :  { %469 = vsyncpa [#allocation6], 1 }
 0x218   :  { %471 = vsyncpa [#allocation6 + $0x1], 1 }
 0x219   :  { %472 = vsyncpa [#allocation4], 1 }
 0x21a   :  { %474 = vsyncpa [#allocation4 + $0x1], 1 }

</bundles_post_ra>
